<compile_context>
chip_gen: v6e
topology: v6e:2x2x1
jax: 0.10.0
libtpu: 0.0.40
codegen_flags: <defaults>
</compile_context>

<pallas_src>
import jax
import jax.numpy as jnp
from jax.experimental import pallas as pl
from jax.experimental.pallas import tpu as pltpu

_LANES = 128


# ----------------------------------------------------------------------------
# Shared slab layout (static row offsets; H assumed multiple of 8).
# ----------------------------------------------------------------------------
def _slab_offsets(H, n_cat):
    ncat_pad = ((n_cat + 7) // 8) * 8
    r_wt = 0                    # (2H, H)  : [Wt0; Wt1]  (in, out)
    r_wf = 2 * H                # (H, 2H)  : [Wf0 | Wf1] (in, out)
    r_wcat = 3 * H              # (n_cat, H): w_cat.T
    r_wint = 3 * H + ncat_pad   # (3H, 2H) : w_inter.T
    r_b = 6 * H + ncat_pad      # 6 bias rows (+2 pad), see pack_params
    rows = r_b + 8
    return r_wt, r_wf, r_wcat, r_wint, r_b, rows


# ----------------------------------------------------------------------------
# Pallas kernel: everything after the embedding gathers.
# ----------------------------------------------------------------------------
def _three_inputs_kernel(te_ref, fe_ref, cat_ref, wslab_ref, out_ref):
    B, L1, H = te_ref.shape
    L2 = fe_ref.shape[1]
    n_cat = cat_ref.shape[1]
    r_wt, r_wf, r_wcat, r_wint, r_b, _ = _slab_offsets(H, n_cat)

    # --- title branch: Conv1d(k=2) -> mean pool ------------------------------
    # mean commutes with the (linear, no-ReLU) conv, so the whole branch is a
    # single (B,2H)@(2H,H) matmul on the pre-averaged shifted means.
    te = te_ref[...]                                        # (B, L1, H)
    inv_t = 1.0 / (L1 - 1)
    m0 = jnp.sum(te[:, :-1, :], axis=1) * inv_t             # (B, H)
    m1 = jnp.sum(te[:, 1:, :], axis=1) * inv_t              # (B, H)
    title = (
        jnp.dot(jnp.concatenate([m0, m1], axis=-1),
                wslab_ref[r_wt:r_wt + 2 * H, 0:H],
                preferred_element_type=jnp.float32)
        + wslab_ref[r_b + 0:r_b + 1, 0:H]
    )                                                       # (B, H)

    # --- full branch: Conv1d(k=2) -> ReLU -> mean pool ------------------------
    # One batched MXU pass against [Wf0 | Wf1]; windows = shifted static slices.
    fe = fe_ref[...]                                        # (B, L2, H)
    wf = wslab_ref[r_wf:r_wf + H, 0:2 * H]                  # (H, 2H)
    wf_b = jnp.broadcast_to(wf[None], (B, H, 2 * H))
    a = jnp.einsum("blh,bhk->blk", fe, wf_b,
                   preferred_element_type=jnp.float32)      # (B, L2, 2H)
    conv = (a[:, :-1, 0:H] + a[:, 1:, H:2 * H]
            + wslab_ref[r_b + 1:r_b + 2, 0:H])              # (B, L2-1, H)
    conv = jnp.maximum(conv, 0.0)
    full = jnp.sum(conv, axis=1) * (1.0 / (L2 - 1))         # (B, H)

    # --- category Linear ------------------------------------------------------
    category = (
        jnp.dot(cat_ref[...], wslab_ref[r_wcat:r_wcat + n_cat, 0:H],
                preferred_element_type=jnp.float32)
        + wslab_ref[r_b + 2:r_b + 3, 0:H]
    )                                                       # (B, H)

    # --- inter_dense on concat([title, full, category]): one K=3H matmul ------
    feats = jnp.concatenate([title, full, category], axis=-1)   # (B, 3H)
    inter = (
        jnp.dot(feats, wslab_ref[r_wint:r_wint + 3 * H, 0:2 * H],
                preferred_element_type=jnp.float32)
        + wslab_ref[r_b + 3:r_b + 4, 0:2 * H]
    )
    inter = jnp.maximum(inter, 0.0)                         # F.relu

    # --- final_dense (out_features=1): VPU multiply + lane reduce -------------
    out_ref[...] = (
        jnp.sum(inter * wslab_ref[r_b + 4:r_b + 5, 0:2 * H],
                axis=-1, keepdims=True)
        + wslab_ref[r_b + 5:r_b + 6, 0:1]
    )


# ----------------------------------------------------------------------------
# One-time parameter packing: everything into a single (rows, 128) f32 slab.
# ----------------------------------------------------------------------------
def pack_params(params):
    H = params["title_emb"].shape[1]
    n_cat = params["w_cat"].shape[1]
    assert H % 8 == 0, "hid_size must be a multiple of 8 for the slab layout"
    r_wt, r_wf, r_wcat, r_wint, r_b, rows = _slab_offsets(H, n_cat)

    # PyTorch Conv1d weight (out_ch, in_ch, k) -> per-tap (in_ch, out_ch).
    wt0 = params["w_conv_title"][:, :, 0].T
    wt1 = params["w_conv_title"][:, :, 1].T
    wf0 = params["w_conv_full"][:, :, 0].T
    wf1 = params["w_conv_full"][:, :, 1].T

    slab = jnp.zeros((rows, _LANES), jnp.float32)
    slab = slab.at[r_wt:r_wt + 2 * H, 0:H].set(
        jnp.concatenate([wt0, wt1], axis=0))                       # (2H, H)
    slab = slab.at[r_wf:r_wf + H, 0:2 * H].set(
        jnp.concatenate([wf0, wf1], axis=1))                       # (H, 2H)
    slab = slab.at[r_wcat:r_wcat + n_cat, 0:H].set(params["w_cat"].T)
    slab = slab.at[r_wint:r_wint + 3 * H, 0:2 * H].set(params["w_inter"].T)
    slab = slab.at[r_b + 0, 0:H].set(params["b_conv_title"])
    slab = slab.at[r_b + 1, 0:H].set(params["b_conv_full"])
    slab = slab.at[r_b + 2, 0:H].set(params["b_cat"])
    slab = slab.at[r_b + 3, 0:2 * H].set(params["b_inter"])
    slab = slab.at[r_b + 4, 0:2 * H].set(params["w_final"][0])
    slab = slab.at[r_b + 5, 0].set(params["b_final"][0])

    return {
        "title_emb": params["title_emb"],
        "full_emb": params["full_emb"],
        "w_slab": slab,
    }


# ----------------------------------------------------------------------------
# Jitted forward: embedding gathers (JAX glue), then one grid-less pallas_call.
# ----------------------------------------------------------------------------
@jax.jit
def three_inputs_net(input1, input2, input3, packed):
    te = packed["title_emb"][input1]   # (B, L1, H)
    fe = packed["full_emb"][input2]    # (B, L2, H)
    B = te.shape[0]

    args = (te, fe, input3.astype(jnp.float32), packed["w_slab"])
    vmem = pl.BlockSpec(memory_space=pltpu.MemorySpace.VMEM)
    return pl.pallas_call(
        _three_inputs_kernel,
        out_shape=jax.ShapeDtypeStruct((B, 1), jnp.float32),
        in_specs=[vmem] * len(args),
        out_specs=vmem,
    )(*args)


# ----------------------------------------------------------------------------
# Pure-JAX reference (mirrors the PyTorch forward) for self-validation.
# ----------------------------------------------------------------------------
def reference_forward(input1, input2, input3, params):
    def conv1d_k2(x_nchw, w, b):  # x: (B, C, L), w: (O, C, 2)
        return (jnp.einsum("bcl,oc->bol", x_nchw[:, :, :-1], w[:, :, 0])
                + jnp.einsum("bcl,oc->bol", x_nchw[:, :, 1:], w[:, :, 1])
                + b[None, :, None])

    te = params["title_emb"][input1].transpose(0, 2, 1)   # (B, H, L1)
    title = conv1d_k2(te, params["w_conv_title"], params["b_conv_title"]).mean(-1)

    fe = params["full_emb"][input2].transpose(0, 2, 1)    # (B, H, L2)
    full = jax.nn.relu(
        conv1d_k2(fe, params["w_conv_full"], params["b_conv_full"])).mean(-1)

    category = input3 @ params["w_cat"].T + params["b_cat"]
    concat = jnp.concatenate([title, full, category], axis=1)
    out = concat @ params["w_inter"].T + params["b_inter"]
    out = jax.nn.relu(out) @ params["w_final"].T + params["b_final"]
    return out


# ----------------------------------------------------------------------------
# Deterministic parameter construction + smoke test.
# ----------------------------------------------------------------------------
def make_params(key, n_tokens, n_cat_features, hid_size):
    ks = jax.random.split(key, 12)
    H = hid_size

    def uni(k, shape, fan_in):
        bound = 1.0 / jnp.sqrt(jnp.float32(fan_in))
        return jax.random.uniform(k, shape, jnp.float32, -bound, bound)

    return {
        "title_emb": jax.random.normal(ks[0], (n_tokens, H), jnp.float32),
        "full_emb": jax.random.normal(ks[1], (n_tokens, H), jnp.float32),
        "w_conv_title": uni(ks[2], (H, H, 2), H * 2),
        "b_conv_title": uni(ks[3], (H,), H * 2),
        "w_conv_full": uni(ks[4], (H, H, 2), H * 2),
        "b_conv_full": uni(ks[5], (H,), H * 2),
        "w_cat": uni(ks[6], (H, n_cat_features), n_cat_features),
        "b_cat": uni(ks[7], (H,), n_cat_features),
        "w_inter": uni(ks[8], (2 * H, 3 * H), 3 * H),
        "b_inter": uni(ks[9], (2 * H,), 3 * H),
        "w_final": uni(ks[10], (1, 2 * H), 2 * H),
        "b_final": uni(ks[11], (1,), 2 * H),
    }


if __name__ == "__main__":
    key = jax.random.PRNGKey(0)
    k_p, k_i1, k_i2, k_i3 = jax.random.split(key, 4)

    n_tokens = 50
    hid_size = 32
    n_cat_features = 6
    B, L1, L2 = 2, 8, 12
    # concat_number_of_features = 3 * hid_size = 96

    params = make_params(k_p, n_tokens, n_cat_features, hid_size)
    packed = pack_params(params)   # one-time packing, outside the jitted path

    input1 = jax.random.randint(k_i1, (B, L1), 0, n_tokens, dtype=jnp.int32)
    input2 = jax.random.randint(k_i2, (B, L2), 0, n_tokens, dtype=jnp.int32)
    input3 = jax.random.normal(k_i3, (B, n_cat_features), jnp.float32)

    out = three_inputs_net(input1, input2, input3, packed)
    out = jax.block_until_ready(out)

    ref = reference_forward(input1, input2, input3, params)
    assert out.shape == (B, 1), out.shape
    assert jnp.allclose(out, ref, rtol=1e-4, atol=1e-4), (out, ref)

    print("KERNEL_OK")
</pallas_src>

<mosaic_0001>
module attributes {stable_mosaic.version = 11 : i64} {
  func.func @_three_inputs_kernel(%arg0: memref<2x8x32xf32, #tpu.memory_space<vmem>>, %arg1: memref<2x12x32xf32, #tpu.memory_space<vmem>>, %arg2: memref<2x6xf32, #tpu.memory_space<vmem>>, %arg3: memref<208x128xf32, #tpu.memory_space<vmem>>, %arg4: memref<2x1xf32, #tpu.memory_space<vmem>>) attributes {dimension_semantics = [], scalar_prefetch = 0 : i64, scratch_operands = 0 : i64, tpu.core_type = #tpu.core_type<tc>} {
    %c0 = arith.constant 0 : index
    %c0_0 = arith.constant 0 : index
    %c0_1 = arith.constant 0 : index
    %0 = vector.load %arg0[%c0, %c0_0, %c0_1] : memref<2x8x32xf32, #tpu.memory_space<vmem>>, vector<2x8x32xf32>
    %1 = vector.extract_strided_slice %0 {offsets = [0, 0, 0], sizes = [2, 7, 32], strides = [1, 1, 1]} : vector<2x8x32xf32> to vector<2x7x32xf32>
    %cst = arith.constant dense<0.000000e+00> : vector<2x32xf32>
    %2 = vector.multi_reduction <add>, %1, %cst [1] : vector<2x7x32xf32> to vector<2x32xf32>
    %cst_2 = arith.constant 0.142857149 : f32
    %3 = vector.broadcast %cst_2 : f32 to vector<2x32xf32>
    %4 = arith.mulf %2, %3 : vector<2x32xf32>
    %5 = vector.extract_strided_slice %0 {offsets = [0, 1, 0], sizes = [2, 7, 32], strides = [1, 1, 1]} : vector<2x8x32xf32> to vector<2x7x32xf32>
    %cst_3 = arith.constant dense<0.000000e+00> : vector<2x32xf32>
    %6 = vector.multi_reduction <add>, %5, %cst_3 [1] : vector<2x7x32xf32> to vector<2x32xf32>
    %cst_4 = arith.constant 0.142857149 : f32
    %7 = vector.broadcast %cst_4 : f32 to vector<2x32xf32>
    %8 = arith.mulf %6, %7 : vector<2x32xf32>
    %9 = tpu.concatenate %4, %8 in 1 : vector<2x32xf32>, vector<2x32xf32> -> vector<2x64xf32>
    %c0_5 = arith.constant 0 : index
    %c0_6 = arith.constant 0 : index
    %10 = vector.load %arg3[%c0_5, %c0_6] : memref<208x128xf32, #tpu.memory_space<vmem>>, vector<64x32xf32>
    %cst_7 = arith.constant dense<0.000000e+00> : vector<2x32xf32>
    %11 = tpu.matmul %9, %10, %cst_7 {dimension_numbers = #tpu.dot_dimension_numbers<[1], [0], [0], [1], [0, 0, 1, 1], [], []>} : vector<2x64xf32>, vector<64x32xf32>, vector<2x32xf32> -> vector<2x32xf32>
    %c200 = arith.constant 200 : index
    %c0_8 = arith.constant 0 : index
    %12 = vector.load %arg3[%c200, %c0_8] : memref<208x128xf32, #tpu.memory_space<vmem>>, vector<1x32xf32>
    %13 = vector.broadcast %12 : vector<1x32xf32> to vector<2x32xf32>
    %14 = arith.addf %11, %13 : vector<2x32xf32>
    %c0_9 = arith.constant 0 : index
    %c0_10 = arith.constant 0 : index
    %c0_11 = arith.constant 0 : index
    %15 = vector.load %arg1[%c0_9, %c0_10, %c0_11] : memref<2x12x32xf32, #tpu.memory_space<vmem>>, vector<2x12x32xf32>
    %c64 = arith.constant 64 : index
    %c0_12 = arith.constant 0 : index
    %16 = vector.load %arg3[%c64, %c0_12] : memref<208x128xf32, #tpu.memory_space<vmem>>, vector<32x64xf32>
    %17 = vector.shape_cast %16 : vector<32x64xf32> to vector<1x32x64xf32>
    %18 = vector.shape_cast %17 : vector<1x32x64xf32> to vector<1x32x64xf32>
    %19 = vector.broadcast %18 : vector<1x32x64xf32> to vector<2x32x64xf32>
    "tpu.trace_start"() <{level = 10 : i32, message = "blh,bhk->blk"}> : () -> ()
    %cst_13 = arith.constant dense<0.000000e+00> : vector<2x12x64xf32>
    %20 = tpu.matmul %15, %19, %cst_13 {dimension_numbers = #tpu.dot_dimension_numbers<[2], [1], [1], [2], [0, 0, 0, 1, 1, 2], [0], [0]>} : vector<2x12x32xf32>, vector<2x32x64xf32>, vector<2x12x64xf32> -> vector<2x12x64xf32>
    "tpu.trace_stop"() : () -> ()
    %21 = vector.extract_strided_slice %20 {offsets = [0, 0, 0], sizes = [2, 11, 32], strides = [1, 1, 1]} : vector<2x12x64xf32> to vector<2x11x32xf32>
    %22 = vector.extract_strided_slice %20 {offsets = [0, 1, 32], sizes = [2, 11, 32], strides = [1, 1, 1]} : vector<2x12x64xf32> to vector<2x11x32xf32>
    %23 = arith.addf %21, %22 : vector<2x11x32xf32>
    %c201 = arith.constant 201 : index
    %c0_14 = arith.constant 0 : index
    %24 = vector.load %arg3[%c201, %c0_14] : memref<208x128xf32, #tpu.memory_space<vmem>>, vector<1x32xf32>
    %25 = vector.shape_cast %24 : vector<1x32xf32> to vector<1x1x32xf32>
    %26 = vector.broadcast %25 : vector<1x1x32xf32> to vector<2x11x32xf32>
    %27 = arith.addf %23, %26 : vector<2x11x32xf32>
    %cst_15 = arith.constant 0.000000e+00 : f32
    %28 = vector.broadcast %cst_15 : f32 to vector<2x11x32xf32>
    %29 = arith.maximumf %27, %28 : vector<2x11x32xf32>
    %cst_16 = arith.constant dense<0.000000e+00> : vector<2x32xf32>
    %30 = vector.multi_reduction <add>, %29, %cst_16 [1] : vector<2x11x32xf32> to vector<2x32xf32>
    %cst_17 = arith.constant 0.0909090936 : f32
    %31 = vector.broadcast %cst_17 : f32 to vector<2x32xf32>
    %32 = arith.mulf %30, %31 : vector<2x32xf32>
    %c0_18 = arith.constant 0 : index
    %c0_19 = arith.constant 0 : index
    %33 = vector.load %arg2[%c0_18, %c0_19] : memref<2x6xf32, #tpu.memory_space<vmem>>, vector<2x6xf32>
    %c96 = arith.constant 96 : index
    %c0_20 = arith.constant 0 : index
    %34 = vector.load %arg3[%c96, %c0_20] : memref<208x128xf32, #tpu.memory_space<vmem>>, vector<6x32xf32>
    %cst_21 = arith.constant dense<0.000000e+00> : vector<2x32xf32>
    %35 = tpu.matmul %33, %34, %cst_21 {dimension_numbers = #tpu.dot_dimension_numbers<[1], [0], [0], [1], [0, 0, 1, 1], [], []>} : vector<2x6xf32>, vector<6x32xf32>, vector<2x32xf32> -> vector<2x32xf32>
    %c202 = arith.constant 202 : index
    %c0_22 = arith.constant 0 : index
    %36 = vector.load %arg3[%c202, %c0_22] : memref<208x128xf32, #tpu.memory_space<vmem>>, vector<1x32xf32>
    %37 = vector.broadcast %36 : vector<1x32xf32> to vector<2x32xf32>
    %38 = arith.addf %35, %37 : vector<2x32xf32>
    %39 = tpu.concatenate %14, %32, %38 in 1 : vector<2x32xf32>, vector<2x32xf32>, vector<2x32xf32> -> vector<2x96xf32>
    %c104 = arith.constant 104 : index
    %c0_23 = arith.constant 0 : index
    %40 = vector.load %arg3[%c104, %c0_23] : memref<208x128xf32, #tpu.memory_space<vmem>>, vector<96x64xf32>
    %cst_24 = arith.constant dense<0.000000e+00> : vector<2x64xf32>
    %41 = tpu.matmul %39, %40, %cst_24 {dimension_numbers = #tpu.dot_dimension_numbers<[1], [0], [0], [1], [0, 0, 1, 1], [], []>} : vector<2x96xf32>, vector<96x64xf32>, vector<2x64xf32> -> vector<2x64xf32>
    %c203 = arith.constant 203 : index
    %c0_25 = arith.constant 0 : index
    %42 = vector.load %arg3[%c203, %c0_25] : memref<208x128xf32, #tpu.memory_space<vmem>>, vector<1x64xf32>
    %43 = vector.broadcast %42 : vector<1x64xf32> to vector<2x64xf32>
    %44 = arith.addf %41, %43 : vector<2x64xf32>
    %cst_26 = arith.constant 0.000000e+00 : f32
    %45 = vector.broadcast %cst_26 : f32 to vector<2x64xf32>
    %46 = arith.maximumf %44, %45 : vector<2x64xf32>
    %c204 = arith.constant 204 : index
    %c0_27 = arith.constant 0 : index
    %47 = vector.load %arg3[%c204, %c0_27] : memref<208x128xf32, #tpu.memory_space<vmem>>, vector<1x64xf32>
    %48 = vector.broadcast %47 : vector<1x64xf32> to vector<2x64xf32>
    %49 = arith.mulf %46, %48 : vector<2x64xf32>
    %cst_28 = arith.constant dense<0.000000e+00> : vector<2xf32>
    %50 = vector.multi_reduction <add>, %49, %cst_28 [1] : vector<2x64xf32> to vector<2xf32>
    %51 = vector.shape_cast %50 : vector<2xf32> to vector<2x1xf32>
    %c205 = arith.constant 205 : index
    %c0_29 = arith.constant 0 : index
    %52 = vector.load %arg3[%c205, %c0_29] : memref<208x128xf32, #tpu.memory_space<vmem>>, vector<1x1xf32>
    %53 = vector.broadcast %52 : vector<1x1xf32> to vector<2x1xf32>
    %54 = arith.addf %51, %53 : vector<2x1xf32>
    %c0_30 = arith.constant 0 : index
    %c0_31 = arith.constant 0 : index
    %55 = vector.load %arg4[%c0_30, %c0_31] : memref<2x1xf32, #tpu.memory_space<vmem>>, vector<2x1xf32>
    tpu.vector_store %arg4[%c0_30, %c0_31], %54 {strides = array<i32>} : memref<2x1xf32, #tpu.memory_space<vmem>>, vector<2x1xf32>,
    return
  }
}

</mosaic_0001>

<bundles_post_ra>
// kernel: three_inputs_net.1
= control target key start
LH: loop header
LB: loop body
LE: loop exit
PB: predicated region body
PF: predicated region fallthrough
CT: control target
= control target key end

     0   :  { %vm19_vm0 = vcmask 260096   ;;  %v728_v2 = vmov 0.0   ;;  %vm729_vm1 = vmmov 0   ;;  %vm69_vm2 = vcmask 261120   ;;  %s730_s20 = smov 32   ;;  %s732_s7 = smov 64   ;;  %s930_s0 = inlined_call_operand.vmem [shape: f32[2,8,32], index: 0, kind: input, shape index: {}]   ;;  %s931_s3 = inlined_call_operand.vmem [shape: f32[208,128], index: 3, kind: input, shape index: {}]   ;;  %s932_s1 = inlined_call_operand.vmem [shape: f32[2,12,32], index: 1, kind: input, shape index: {}]   ;;  %s933_s2 = inlined_call_operand.vmem [shape: f32[2,6], index: 2, kind: input, shape index: {}]   ;;  %s934_s4 = inlined_call_operand.vmem [shape: f32[2,1], index: 4, kind: output, shape index: {}]  }
   0x1   :  { %v17_v0 = vld [vmem:[%s930_s0] sm:$0xff]  ;;  %v18_v1 = vld [vmem:[%s930_s0 + $0x8] sm:$0xff]  ;;  %650 = vmatprep.subr.mxu0 %v728_v2  ;;  %v78_v3 = vld [vmem:[%s931_s3 + $0x38] sm:$0xff]  ;;  %666 = vmatprep.mubr.msk.f32.mxu0 %vm729_vm1, %v728_v2  ;;  %vm60_vm3 = vcmask 1041409   ;;  %vm84_vm4 = vcmask 523264   ;;  %vm400_vm5 = vcmask 1045504  }
   0x2   :  { %v38_v4 = vrot.slane %v17_v0, 1  ;;  %v39_v5 = vrot.slane %v18_v1, 1  ;;  %651 = vmatpush3.msra.mxu0 %v78_v3  ;;  %v77_v6 = vld [vmem:[%s931_s3 + $0x30] sm:$0xff]  ;;  %v27_v7 = vsel %vm19_vm0, %v18_v1, 0.0  ;;  %v76_v8 = vld [vmem:[%s931_s3 + $0x28] sm:$0xff]  ;;  %v20_v10 = vsel %vm19_vm0, %v17_v0, 0.0 }
   0x3   :  { %652 = vmatprep.subr.mxu0 %v728_v2  ;;  %v28_v9 = vrot.slane %v27_v7, 4  ;;  %v21_v13 = vrot.slane %v20_v10, 4  ;;  %v75_v16 = vld [vmem:[%s931_s3 + $0x20] sm:$0xff]  ;;  %v782_v19 = vld [vmem:[%s931_s3 + $0x58] sm:$0xff]  ;;  %v73_v27 = vld [vmem:[%s931_s3 + $0x10] sm:$0xff]  ;;  %vm396_vm6 = vcmask 48128  }
   0x4   :  { %v42_v11 = vsel %vm19_vm0, %v38_v4, 0.0  ;;  %v49_v12 = vsel %vm19_vm0, %v39_v5, 0.0  ;;  %653 = vmatpush3.msra.mxu0 %v77_v6  ;;  %v74_v22 = vld [vmem:[%s931_s3 + $0x18] sm:$0xff]  ;;  %680 = vmatprep.subr.mxu1 %v782_v19  ;;  %v164_v29 = vld [vmem:[%s931_s3 + $0x50] sm:$0xff]  ;;  %v72_v33 = vld [vmem:[%s931_s3 + $0x8] sm:$0xff]  ;;  %vm332_vm7 = vcmask 1046528  }
   0x5   :  { %v43_v14 = vrot.slane %v42_v11, 4  ;;  %v50_v15 = vrot.slane %v49_v12, 4  ;;  %654 = vmatprep.subr.mxu0 %v728_v2  ;;  %v29_v17 = vadd.f32 %v28_v9, %v27_v7  ;;  %v22_v18 = vadd.f32 %v21_v13, %v20_v10  ;;  %681 = vmatpush3.msra.mxu1 %v782_v19  ;;  %v163_v35 = vld [vmem:[%s931_s3 + $0x48] sm:$0xff]  ;;  %v71_v39 = vld [vmem:[%s931_s3] sm:$0xff]  ;;  %v160_v46 = vld [vmem:[%s932_s1 + $0x10] sm:$0xff] }
   0x6   :  { %655 = vmatpush3.msra.mxu0 %v76_v8  ;;  %682 = vmatprep.subr.mxu1 %v164_v29  ;;  %v162_v41 = vld [vmem:[%s931_s3 + $0x40] sm:$0xff]  ;;  %v161_v48 = vld [vmem:[%s932_s1 + $0x18] sm:$0xf]  ;;  %v159_v56 = vld [vmem:[%s932_s1 + $0x8] sm:$0xf]  ;;  %vm369_vm8 = vcmask 256000  }
   0x7   :  { %v44_v20 = vadd.f32 %v43_v14, %v42_v11  ;;  %v51_v21 = vadd.f32 %v50_v15, %v49_v12  ;;  %656 = vmatprep.subr.mxu0 %v728_v2  ;;  %v30_v23 = vrot.slane %v29_v17, 2  ;;  %v23_v24 = vrot.slane %v22_v18, 2  ;;  %683 = vmatpush3.msra.mxu1 %v164_v29  ;;  %v158_v54 = vld [vmem:[%s932_s1] sm:$0xff]  ;;  %s731_s1 = smov 96   ;;  %v607_v10 = vld [vmem:[%s931_s3 + $0xca] ss:$0 sm:$0xff] }
   0x8   :  { %657 = vmatpush3.msra.mxu0 %v75_v16  ;;  %684 = vmatprep.subr.mxu1 %v163_v35  ;;  %v390_v57 = vld [vmem:[%s931_s3 + $0x60] sm:$0x3f]  ;;  %v496_v13 = vld [vmem:[%s931_s3 + $0xb8] sm:$0xff]  ;;  %v495_v14 = vld [vmem:[%s931_s3 + $0xb0] sm:$0xff]  ;;  %vm503_vm9 = vcmask 785408   ;;  %vm584_vm10 = vcmask 517120  }
   0x9   :  { %v45_v25 = vrot.slane %v44_v20, 2  ;;  %v52_v26 = vrot.slane %v51_v21, 2  ;;  %658 = vmatprep.subr.mxu0 %v728_v2  ;;  %v31_v28 = vadd.f32 %v30_v23, %v29_v17  ;;  %v24_v30 = vadd.f32 %v23_v24, %v22_v18  ;;  %685 = vmatpush3.msra.mxu1 %v163_v35  ;;  %v389_v58 = vld [vmem:[%s933_s2] sm:$0x3]  ;;  %v494_v15 = vld [vmem:[%s931_s3 + $0xa8] sm:$0xff]  ;;  %v492_v17 = vld [vmem:[%s931_s3 + $0x98] sm:$0xff] }
   0xa   :  { %659 = vmatpush3.msra.mxu0 %v74_v22  ;;  %686 = vmatprep.subr.mxu1 %v162_v41  ;;  %v497_v12 = vld [vmem:[%s931_s3 + $0xc0] sm:$0xff]  ;;  %v491_v18 = vld [vmem:[%s931_s3 + $0x90] sm:$0xff]  ;;  %v606_v23 = vld [vmem:[%s931_s3 + $0xc9] ss:$0 sm:$0xff]  ;;  %vm594_vm11 = vcmask 1024  }
   0xb   :  { %v46_v31 = vadd.f32 %v45_v25, %v44_v20  ;;  %v53_v32 = vadd.f32 %v52_v26, %v51_v21  ;;  %660 = vmatprep.subr.mxu0 %v728_v2  ;;  %v32_v34 = vrot.slane %v31_v28, 1  ;;  %v25_v36 = vrot.slane %v24_v30, 1  ;;  %687 = vmatpush3.msra.mxu1 %v162_v41  ;;  %v493_v16 = vld [vmem:[%s931_s3 + $0xa0] sm:$0xff]  ;;  %v488_v21 = vld [vmem:[%s931_s3 + $0x78] sm:$0xff]  ;;  %v487_v22 = vld [vmem:[%s931_s3 + $0x70] sm:$0xff] }
   0xc   :  { %661 = vmatpush3.msra.mxu0 %v73_v27  ;;  %688 = vmatprep.mubr.msk.f32.mxu1 %vm69_vm2, %v160_v46  ;;  %v489_v20 = vld [vmem:[%s931_s3 + $0x80] sm:$0xff] }
   0xd   :  { %v47_v37 = vrot.slane %v46_v31, 1  ;;  %v54_v38 = vrot.slane %v53_v32, 1  ;;  %662 = vmatprep.subr.mxu0 %v728_v2  ;;  %v33_v40 = vadd.f32 %v32_v34, %v31_v28  ;;  %v26_v42 = vadd.f32 %v25_v36, %v24_v30  ;;  %689 = vmatmul.mubr.msk.f32.vlgmr.msra.gmra.mxu1 %vm69_vm2, %v161_v48 }
   0xe   :  { %663 = vmatpush3.msra.mxu0 %v72_v33  ;;  %696 = vmatprep.subr.mxu1 %v728_v2 }
   0xf   :  { %v48_v43 = vadd.f32 %v47_v37, %v46_v31  ;;  %v55_v44 = vadd.f32 %v54_v38, %v53_v32  ;;  %664 = vmatprep.subr.mxu0 %v728_v2  ;;  %v35_v45 = vmul.f32 0.14285715, %v33_v40  ;;  %v34_v47 = vmul.f32 0.14285715, %v26_v42  ;;  %720 = vmatprep.mubr.msk.f32.mxu1 %vm729_vm1, %v728_v2 }
  0x10   :  { %665 = vmatpush3.msra.mxu0 %v71_v39  ;;  %697 = vmatpush3.msra.mxu1 %v497_v12  ;;  %v613_v12 = vld [vmem:[%s931_s3 + $0xcd] ss:$0 sm:$0xff] }
  0x11   :  { %v56_v49 = vmul.f32 0.14285715, %v48_v43  ;;  %v57_v50 = vmul.f32 0.14285715, %v55_v44  ;;  %669 = vmatprep.subr.mxu0 %v782_v19  ;;  %v61_v51 = vsel %vm60_vm3, %v35_v45, %v34_v47  ;;  %698 = vmatprep.subr.mxu1 %v728_v2 }
  0x12   :  { %699 = vmatpush3.msra.mxu1 %v496_v13 }
  0x13   :  { %v65_v52 = vsel %vm60_vm3, %v57_v50, %v56_v49  ;;  %700 = vmatprep.subr.mxu1 %v728_v2 }
  0x14   :  { %66 = vrot.lane.b32.xlu0 %v65_v52, %s730_s20  ;;  %701 = vmatpush3.msra.mxu1 %v495_v14 }
  0x15   :  { %702 = vmatprep.subr.mxu1 %v728_v2 }
  0x16   :  { %703 = vmatpush3.msra.mxu1 %v494_v15 }
  0x17   :  { %704 = vmatprep.subr.mxu1 %v728_v2 }
  0x18   :  { %705 = vmatpush3.msra.mxu1 %v493_v16 }
  0x19   :  { %706 = vmatprep.subr.mxu1 %v728_v2 }
  0x1a   :  { %707 = vmatpush3.msra.mxu1 %v492_v17 }
  0x1b   :  { %708 = vmatprep.subr.mxu1 %v728_v2 }
  0x1c   :  { %709 = vmatpush3.msra.mxu1 %v491_v18 }
  0x1d   :  { %710 = vmatprep.subr.mxu1 %v728_v2 }
  0x86   :  { %v67_v53 = vpop.permute.xlu0 %66 }
  0x87   :  { %v70_v55 = vsel %vm69_vm2, %v61_v51, %v67_v53  ;;  %v486_v51 = vld [vmem:[%s931_s3 + $0x68] sm:$0xff] }
  0x88   :  { %667 = vmatmul.mubr.msk.f32.vlgmr.msra.gmra.mxu0 %vm84_vm4, %v70_v55 }
  0x89   :  { %670 = vmatpush3.msra.mxu0 %v782_v19  ;;  %677 = vmatprep.mubr.msk.f32.mxu0 %vm69_vm2, %v158_v54  ;;  %v490_v19 = vld [vmem:[%s931_s3 + $0x88] sm:$0xff] }
  0x8a   :  { %671 = vmatprep.subr.mxu0 %v164_v29  ;;  %711 = vmatpush3.msra.mxu1 %v490_v19 }
  0x8b   :  { %672 = vmatpush3.msra.mxu0 %v164_v29  ;;  %712 = vmatprep.subr.mxu1 %v728_v2 }
  0x8c   :  { %673 = vmatprep.subr.mxu0 %v163_v35  ;;  %713 = vmatpush3.msra.mxu1 %v489_v20 }
  0x8d   :  { %674 = vmatpush3.msra.mxu0 %v163_v35  ;;  %714 = vmatprep.subr.mxu1 %v728_v2 }
  0x8e   :  { %675 = vmatprep.subr.mxu0 %v162_v41  ;;  %715 = vmatpush3.msra.mxu1 %v488_v21 }
  0x8f   :  { %676 = vmatpush3.msra.mxu0 %v162_v41  ;;  %716 = vmatprep.subr.mxu1 %v728_v2 }
  0x90   :  { %678 = vmatmul.mubr.msk.f32.vlgmr.msra.gmra.mxu0 %vm69_vm2, %v159_v56  ;;  %691 = vmatprep.subr.mxu0 %v728_v2 }
  0x91   :  { %692 = vmatpush3.msk.msra.mxu0 %vm400_vm5, %v390_v57  ;;  %693 = vmatprep.mubr.msk.f32.mxu0 %vm729_vm1, %v728_v2 }
  0x92   :  { %717 = vmatpush3.msra.mxu1 %v487_v22 }
  0x93   :  { %718 = vmatprep.subr.mxu1 %v728_v2 }
  0x94   :  { %694 = vmatmul.mubr.msk.f32.vlgmr.msra.gmra.mxu0 %vm396_vm6, %v389_v58  ;;  %719 = vmatpush3.msra.mxu1 %v486_v51 }
  0xcd   :  { %v851_v60 = vpop.f32.mrf.mxu1 }
  0xce   :  { %v337_v0 = vrot.slane %v851_v60, 1 }
  0xcf   :  { %v319_v62 = vpop.f32.mrf.mxu1 }
  0xd0   :  { %v336_v1 = vrot.slane %v319_v62, 1 }
  0xd2   :  { %v338_v6 = vsel %vm332_vm7, %v336_v1, %v337_v0 }
 0x148   :  { %v849_v59 = vpop.f32.mrf.mxu0 }
 0x14a   :  { %v668_v61 = vpop.f32.mrf.mxu0 }
 0x150   :  { %v679_v63 = vpop.f32.mrf.mxu0 }
 0x151   :  { %v334_v3 = vrot.slane %v679_v63, 1 }
 0x152   :  { %v238_v4 = vpop.f32.mrf.mxu0 }
 0x153   :  { %v333_v5 = vrot.slane %v238_v4, 1  ;;  %341 = vrot.lane.b32.xlu1 %v334_v3, %s731_s1 }
 0x154   :  { %v470_v8 = vpop.f32.mrf.mxu0 }
 0x155   :  { %v335_v7 = vsel %vm332_vm7, %v333_v5, %v334_v3  ;;  %v471_v11 = vadd.f32 %v607_v10, %v470_v8  ;;  %v610_v5 = vld [vmem:[%s931_s3 + $0xcb] ss:$0 sm:$0xff] }
 0x156   :  { %339 = vrot.lane.b32.xlu0 %v335_v7, %s731_s1  ;;  %v695_v9 = vpop.f32.mrf.mxu0 }
 0x157   :  { %343 = vrot.lane.b32.xlu1 %v338_v6, %s731_s1  ;;  %v612_v9 = vld [vmem:[%s931_s3 + $0xcc] ss:$0 sm:$0xff] }
 0x15a   :  { %345 = vrot.lane.b32.xlu0 %v337_v0, %s731_s1 }
 0x15e   :  { %481 = vrot.lane.b32.xlu0 %v471_v11, %s732_s7 }
 0x1c5   :  { %v342_v24 = vpop.permute.xlu1 %341 }
 0x1c6   :  { %v352_v25 = vadd.f32 %v679_v63, %v342_v24 }
 0x1c8   :  { %v361_v26 = vadd.f32 %v606_v23, %v352_v25  ;;  %v340_v27 = vpop.permute.xlu0 %339 }
 0x1c9   :  { %v351_v28 = vadd.f32 %v340_v27, %v238_v4  ;;  %v344_v29 = vpop.permute.xlu1 %343 }
 0x1ca   :  { %v353_v30 = vadd.f32 %v344_v29, %v319_v62  ;;  %v365_v31 = vmax.f32 %v361_v26, 0.0  ;;  %v600_v62 = vld [vmem:[%s931_s3 + $0xc8] ss:$0 sm:$0xff] }
 0x1cb   :  { %v360_v32 = vadd.f32 %v606_v23, %v351_v28  ;;  %v155_v63 = vadd.f32 %v600_v62, %v849_v59 }
 0x1cc   :  { %v362_v33 = vadd.f32 %v606_v23, %v353_v30  ;;  %v346_v34 = vpop.permute.xlu0 %345  ;;  %v370_v2 = vsel %vm369_vm8, %v365_v31, 0.0 }
 0x1cd   :  { %v364_v35 = vmax.f32 %v360_v32, 0.0  ;;  %v354_v36 = vadd.f32 %v851_v60, %v346_v34 }
 0x1ce   :  { %v366_v38 = vmax.f32 %v362_v33, 0.0 }
 0x1cf   :  { %v368_v37 = vsel %vm69_vm2, %v364_v35, 0.0  ;;  %v363_v39 = vadd.f32 %v606_v23, %v354_v36 }
 0x1d0   :  { %v371_v40 = vadd.f32 %v370_v2, %v368_v37  ;;  %v378_v43 = vsel %vm69_vm2, %v366_v38, 0.0  ;;  %v482_v0 = vpop.permute.xlu0 %481 }
 0x1d1   :  { %v367_v41 = vmax.f32 %v363_v39, 0.0 }
 0x1d2   :  { %v372_v42 = vrot.slane %v371_v40, 4 }
 0x1d3   :  { %v379_v44 = vsel %vm369_vm8, %v367_v41, 0.0 }
 0x1d4   :  { %v373_v45 = vadd.f32 %v372_v42, %v371_v40  ;;  %v380_v46 = vadd.f32 %v379_v44, %v378_v43 }
 0x1d6   :  { %v374_v47 = vrot.slane %v373_v45, 2  ;;  %v381_v48 = vrot.slane %v380_v46, 4 }
 0x1d8   :  { %v382_v49 = vadd.f32 %v381_v48, %v380_v46  ;;  %v375_v50 = vadd.f32 %v374_v47, %v373_v45 }
 0x1da   :  { %v383_v52 = vrot.slane %v382_v49, 2  ;;  %v376_v53 = vrot.slane %v375_v50, 1 }
 0x1dc   :  { %v384_v54 = vadd.f32 %v383_v52, %v382_v49  ;;  %v377_v55 = vadd.f32 %v376_v53, %v375_v50 }
 0x1de   :  { %v385_v56 = vrot.slane %v384_v54, 1  ;;  %v387_v58 = vmul.f32 0.09090909, %v377_v55 }
 0x1e0   :  { %v386_v57 = vadd.f32 %v385_v56, %v384_v54 }
 0x1e2   :  { %v388_v60 = vmul.f32 0.09090909, %v386_v57 }
 0x1e4   :  { %v476_v61 = vsel %vm60_vm3, %v388_v60, %v387_v58 }
 0x1e5   :  { %477 = vrot.lane.b32.xlu1 %v476_v61, %s730_s20 }
 0x257   :  { %v478_v1 = vpop.permute.xlu1 %477 }
 0x258   :  { %v484_v3 = vsel %vm69_vm2, %v155_v63, %v478_v1 }
 0x259   :  { %v485_v4 = vsel %vm84_vm4, %v484_v3, %v482_v0 }
 0x25a   :  { %721 = vmatmul.mubr.msk.f32.vlgmr.msra.gmra.mxu1 %vm503_vm9, %v485_v4 }
 0x31a   :  { %v573_v6 = vpop.f32.mrf.mxu1 }
 0x31b   :  { %v574_v7 = vadd.f32 %v610_v5, %v573_v6 }
 0x31c   :  { %v722_v8 = vpop.f32.mrf.mxu1 }
 0x31d   :  { %v577_v59 = vmax.f32 %v574_v7, 0.0 }
 0x31f   :  { %v583_v10 = vmul.f32 %v612_v9, %v577_v59 }
 0x321   :  { %v585_v11 = vsel %vm584_vm10, %v583_v10, 0.0 }
 0x322   :  { %586 = vadd.xlane.f32.xlu1 %v585_v11 }
 0x3ab   :  { %v587_v13 = vpop.xlane.xlu1 %586 }
 0x3ac   :  { %v593_v14 = vadd.f32 %v613_v12, %v587_v13 }
 0x3ae   :  { %595 = vst.msk [vmem:[%s934_s4] sm:$0x3] %vm594_vm11, %v593_v14 }

</bundles_post_ra>
